<compile_context>
chip_gen: v5e
topology: v5e:2x2
jax: 0.10.0
libtpu: 0.0.40
codegen_flags: <defaults>
</compile_context>

<pallas_src>
import functools

import jax
import jax.numpy as jnp
import numpy as np
from jax import lax
from jax.experimental import pallas as pl
from jax.experimental.pallas import tpu as pltpu


def cornn_kernel(xp_ref, mT_ref, hy_ref, *, t_total, t_chunk):
    """One grid step == one chunk of t_chunk timesteps of the recurrence.

    xp_ref: (t_chunk, B_pad, H_pad) precomputed input projection (Wx x + bias)
    mT_ref: (H_pad, H_pad) circular-Conv1d-as-block-circulant matrix, transposed
    hy_ref: (B_pad, H_pad) hidden state; constant output index map keeps it
            VMEM-resident across the whole grid (accumulator pattern).
    """
    c = pl.program_id(0)

    @pl.when(c == 0)
    def _():
        hy_ref[...] = jnp.zeros_like(hy_ref)

    mT = mT_ref[...]
    # Number of real (non-padded) timesteps in this chunk (t_total is static).
    valid = t_total - c * t_chunk

    def body(t, hy):
        pre = xp_ref[t] + jnp.dot(hy, mT, preferred_element_type=jnp.float32)
        hy_new = jnp.tanh(pre)                 # act='tanh'
        return jnp.where(t < valid, hy_new, hy)  # mask padded tail timesteps

    hy_ref[...] = lax.fori_loop(0, t_chunk, body, hy_ref[...])


def conv1d_circular_as_matrix(w, n_ch, n_hid, ksize):
    """M (H,H) s.t. Conv1d_circular(h.view(B,n_ch,n_hid)).flatten(1) == h @ M.T (no bias)."""
    pad = ksize // 2
    H = n_ch * n_hid
    M = np.zeros((H, H), dtype=np.float32)
    w = np.asarray(w)
    for co in range(n_ch):
        for ci in range(n_ch):
            for k in range(ksize):
                for l in range(n_hid):
                    m = (l + k - pad) % n_hid
                    M[co * n_hid + l, ci * n_hid + m] += w[co, ci, k]
    return jnp.asarray(M)


def _round_up(x, m):
    return ((x + m - 1) // m) * m


def cornn_forward(x, params, n_ch, n_hid, ksize, t_chunk=128):
    T, B, n_inp = x.shape
    H = n_ch * n_hid

    # ---- glue (runs once, plain XLA) ---------------------------------------
    # circular Conv1d over the hidden state == block-circulant (H,H) matmul
    M = conv1d_circular_as_matrix(params["wy_w"], n_ch, n_hid, ksize)
    bias = params["wx_b"] + jnp.repeat(params["wy_b"], n_hid)            # (H,)

    # Hoisted input projection: one big matmul instead of T tiny ones.
    x_proj = (x.reshape(T * B, n_inp) @ params["wx_w"].T + bias).reshape(T, B, H)
    x_proj = x_proj.astype(jnp.float32)

    # Lane/sublane-dense padding; padded timesteps are masked inside the kernel.
    t_chunk = int(min(t_chunk, T))
    B_pad = _round_up(B, 8)
    H_pad = _round_up(H, 128)
    T_pad = _round_up(T, t_chunk)

    x_proj_p = jnp.zeros((T_pad, B_pad, H_pad), jnp.float32)
    x_proj_p = x_proj_p.at[:T, :B, :H].set(x_proj)
    mT_p = jnp.zeros((H_pad, H_pad), jnp.float32).at[:H, :H].set(M.T)

    kernel = functools.partial(cornn_kernel, t_total=T, t_chunk=t_chunk)

    grid_spec = pltpu.PrefetchScalarGridSpec(
        num_scalar_prefetch=0,
        grid=(T_pad // t_chunk,),
        in_specs=[
            pl.BlockSpec((t_chunk, B_pad, H_pad), lambda c: (c, 0, 0)),  # x_proj chunk
            pl.BlockSpec((H_pad, H_pad), lambda c: (0, 0)),              # conv matrix^T (invariant)
        ],
        out_specs=pl.BlockSpec((B_pad, H_pad), lambda c: (0, 0)),        # hy (VMEM-resident)
    )
    hy_pad = pl.pallas_call(
        kernel,
        out_shape=jax.ShapeDtypeStruct((B_pad, H_pad), jnp.float32),
        grid_spec=grid_spec,
        compiler_params=pltpu.CompilerParams(
            dimension_semantics=("arbitrary",)),   # serial carry over time chunks
    )(x_proj_p, mT_p)

    hy = hy_pad[:B, :H]
    # Readout runs once -> wrapper (plain XLA); keeps the kernel hot loop clean.
    return hy @ params["readout_w"].T + params["readout_b"]


def cornn_reference(x, params, n_ch, n_hid, ksize):
    """Pure-JAX reference mirroring the PyTorch forward."""
    T, B, n_inp = x.shape
    H = n_ch * n_hid
    pad = ksize // 2
    hy = jnp.zeros((B, H), jnp.float32)
    for t in range(T):
        wx = x[t] @ params["wx_w"].T + params["wx_b"]
        h3 = hy.reshape(B, n_ch, n_hid)
        h_pad = jnp.concatenate([h3[..., n_hid - pad:], h3, h3[..., :pad]], axis=-1)
        conv = jnp.zeros((B, n_ch, n_hid), jnp.float32)
        for co in range(n_ch):
            acc = jnp.zeros((B, n_hid), jnp.float32)
            for ci in range(n_ch):
                for k in range(ksize):
                    acc = acc + params["wy_w"][co, ci, k] * h_pad[:, ci, k:k + n_hid]
            conv = conv.at[:, co, :].set(acc + params["wy_b"][co])
        hy = jnp.tanh(wx + conv.reshape(B, H))
    return hy @ params["readout_w"].T + params["readout_b"]


if __name__ == "__main__":
    # small shapes consistent with the module: seq T, batch B, per-step input n_inp,
    # hidden n_hid (spatial = sqrt(n_hid) = 4), channels n_ch, 10 classes out.
    T, B = 8, 2
    n_inp, n_hid, n_ch, ksize, n_out = 4, 16, 4, 3, 10
    H = n_ch * n_hid

    key = jax.random.PRNGKey(0)
    k1, k2, k3, k4, k5 = jax.random.split(key, 5)

    # Wx: nn.Linear(n_inp, n_hid*n_ch); weight ~ normal(0, 0.001) (solo_init='no')
    wx_w = 0.001 * jax.random.normal(k1, (H, n_inp), jnp.float32)
    wx_b = (1.0 / np.sqrt(n_inp)) * jax.random.uniform(k2, (H,), jnp.float32, -1.0, 1.0)

    # Wy: nn.Conv1d(n_ch, n_ch, ksize, circular); weight = dirac (init='eye')
    wy_w_np = np.zeros((n_ch, n_ch, ksize), np.float32)
    for c in range(n_ch):
        wy_w_np[c, c, ksize // 2] = 1.0
    wy_w = jnp.asarray(wy_w_np)
    wy_b = (1.0 / np.sqrt(n_ch * ksize)) * jax.random.uniform(k3, (n_ch,), jnp.float32, -1.0, 1.0)

    # readout: nn.Linear(n_hid*n_ch, n_out) (mlp_decoder=False)
    readout_w = (1.0 / np.sqrt(H)) * jax.random.uniform(k4, (n_out, H), jnp.float32, -1.0, 1.0)
    readout_b = (1.0 / np.sqrt(H)) * jax.random.uniform(k5, (n_out,), jnp.float32, -1.0, 1.0)

    params = dict(wx_w=wx_w, wx_b=wx_b, wy_w=wy_w, wy_b=wy_b,
                  readout_w=readout_w, readout_b=readout_b)

    x = jax.random.normal(jax.random.PRNGKey(42), (T, B, n_inp), jnp.float32)

    # t_chunk=4 -> grid of 2 time-chunks, exercising the hy carry across grid steps.
    out = jax.block_until_ready(cornn_forward(x, params, n_ch, n_hid, ksize, t_chunk=4))
    ref = cornn_reference(x, params, n_ch, n_hid, ksize)
    np.testing.assert_allclose(np.asarray(out), np.asarray(ref), rtol=1e-4, atol=1e-4)
    print("KERNEL_OK")
</pallas_src>

<mosaic_0001>
module attributes {stable_mosaic.version = 11 : i64} {
  func.func @cornn_kernel(%arg0: i32, %arg1: memref<4x8x128xf32, #tpu.memory_space<vmem>>, %arg2: memref<128x128xf32, #tpu.memory_space<vmem>>, %arg3: memref<8x128xf32, #tpu.memory_space<vmem>>) attributes {dimension_semantics = [#tpu.dimension_semantics<arbitrary>], iteration_bounds = array<i64: 2>, scalar_prefetch = 0 : i64, scratch_operands = 0 : i64, tpu.core_type = #tpu.core_type<tc>, window_params = [{transform_indices = @transform_0, window_bounds = array<i64: 4, 8, 128>}, {pipeline_mode = #tpu.pipeline_mode<synchronous>, transform_indices = @transform_1, window_bounds = array<i64: 128, 128>}, {pipeline_mode = #tpu.pipeline_mode<synchronous>, transform_indices = @transform_2, window_bounds = array<i64: 8, 128>}]} {
    %c0_i32 = arith.constant 0 : i32
    %0 = arith.cmpi eq, %arg0, %c0_i32 : i32
    %1 = arith.extui %0 : i1 to i32
    %c0_i32_0 = arith.constant 0 : i32
    %2 = arith.cmpi ne, %1, %c0_i32_0 : i32
    scf.if %2 {
      %cst = arith.constant 0.000000e+00 : f32
      %10 = vector.broadcast %cst : f32 to vector<8x128xf32>
      %c0_9 = arith.constant 0 : index
      %c0_10 = arith.constant 0 : index
      %11 = vector.load %arg3[%c0_9, %c0_10] : memref<8x128xf32, #tpu.memory_space<vmem>>, vector<8x128xf32>
      tpu.vector_store %arg3[%c0_9, %c0_10], %10 {strides = array<i32>} : memref<8x128xf32, #tpu.memory_space<vmem>>, vector<8x128xf32>,
    } else {
    }
    %c0 = arith.constant 0 : index
    %c0_1 = arith.constant 0 : index
    %3 = vector.load %arg2[%c0, %c0_1] : memref<128x128xf32, #tpu.memory_space<vmem>>, vector<128x128xf32>
    %c4_i32 = arith.constant 4 : i32
    %4 = arith.muli %arg0, %c4_i32 : i32
    %c8_i32 = arith.constant 8 : i32
    %5 = arith.subi %c8_i32, %4 : i32
    %c0_2 = arith.constant 0 : index
    %c0_3 = arith.constant 0 : index
    %6 = vector.load %arg3[%c0_2, %c0_3] : memref<8x128xf32, #tpu.memory_space<vmem>>, vector<8x128xf32>
    %c0_i32_4 = arith.constant 0 : i32
    %c4_i32_5 = arith.constant 4 : i32
    %7 = arith.addi %c0_i32_4, %c4_i32_5 : i32
    %c1_i32 = arith.constant 1 : i32
    %8 = scf.for %arg4 = %c0_i32_4 to %7 step %c1_i32 iter_args(%arg5 = %6) -> (vector<8x128xf32>)  : i32 {
      %10 = arith.index_cast %arg4 : i32 to index
      %c0_9 = arith.constant 0 : index
      %c0_10 = arith.constant 0 : index
      %11 = vector.load %arg1[%10, %c0_9, %c0_10] : memref<4x8x128xf32, #tpu.memory_space<vmem>>, vector<1x8x128xf32>
      %12 = vector.shape_cast %11 : vector<1x8x128xf32> to vector<8x128xf32>
      %cst = arith.constant dense<0.000000e+00> : vector<8x128xf32>
      %13 = tpu.matmul %arg5, %3, %cst {dimension_numbers = #tpu.dot_dimension_numbers<[1], [0], [0], [1], [0, 0, 1, 1], [], []>} : vector<8x128xf32>, vector<128x128xf32>, vector<8x128xf32> -> vector<8x128xf32>
      %14 = arith.addf %12, %13 : vector<8x128xf32>
      %15 = math.tanh %14 : vector<8x128xf32>
      %16 = arith.cmpi slt, %arg4, %5 : i32
      %17 = arith.select %16, %15, %arg5 : vector<8x128xf32>
      scf.yield %17 : vector<8x128xf32>
    }
    %c4_i32_6 = arith.constant 4 : i32
    %c0_7 = arith.constant 0 : index
    %c0_8 = arith.constant 0 : index
    %9 = vector.load %arg3[%c0_7, %c0_8] : memref<8x128xf32, #tpu.memory_space<vmem>>, vector<8x128xf32>
    tpu.vector_store %arg3[%c0_7, %c0_8], %8 {strides = array<i32>} : memref<8x128xf32, #tpu.memory_space<vmem>>, vector<8x128xf32>,
    return
  }
  func.func @transform_0(%arg0: i32) -> (i32, i32, i32) {
    %c0_i32 = arith.constant 0 : i32
    %c0_i32_0 = arith.constant 0 : i32
    %c0_i32_1 = arith.constant 0 : i32
    return %arg0, %c0_i32, %c0_i32_0 : i32, i32, i32
  }
  func.func @transform_1(%arg0: i32) -> (i32, i32) {
    %c0_i32 = arith.constant 0 : i32
    %c0_i32_0 = arith.constant 0 : i32
    %c0_i32_1 = arith.constant 0 : i32
    return %c0_i32, %c0_i32_0 : i32, i32
  }
  func.func @transform_2(%arg0: i32) -> (i32, i32) {
    %c0_i32 = arith.constant 0 : i32
    %c0_i32_0 = arith.constant 0 : i32
    %c0_i32_1 = arith.constant 0 : i32
    return %c0_i32, %c0_i32_0 : i32, i32
  }
}

</mosaic_0001>

<bundles_post_ra>
// kernel: tpu_custom_call.1
= control target key start
LH: loop header
LB: loop body
LE: loop exit
PB: predicated region body
PF: predicated region fallthrough
CT: control target
= control target key end

     0   :  { %7 = vsyncpa [#allocation3], 0  ;;  %s705_s0 = inlined_call_operand.hbm [shape: f32[8,8,128], index: 0, kind: input, shape index: {}]   ;;  %s706_s1 = inlined_call_operand.hbm [shape: f32[128,128], index: 1, kind: input, shape index: {}]   ;;  %s707_s2 = inlined_call_operand.hbm [shape: f32[8,128], index: 2, kind: output, shape index: {}]  }
   0x1   :  { %9 = vsyncpa [#allocation3 + $0x1], 0 }
   0x2   :  { %10 = vsyncpa [#allocation6], 0 }
   0x3   :  { %11 = vsyncpa [#allocation4], 0  ;;  %s575_s9 = smov 0   ;;  %s577_s10 = smov 0  }
   0x4   :  { %s579_s11 = smov 0   ;;  %s581_s12 = smov 0  }
   0x5 LB: > { %s594_s13 = sadd.s32 4294967295, %s545_s12   ;;  %p37_p0 = scmp.ne.s32.totalorder %s537_s10, %s533_s9  ;;  %s545_s12 = sphi %s581_s12, %s714_s12   ;;  %s541_s11 = sphi %s579_s11, %s713_s11   ;;  %s537_s10 = sphi %s577_s10, %s712_s10   ;;  %s533_s9 = sphi %s575_s9, %s711_s9  }
   0x6   : > { %p38_p1 = scmp.eq.s32.totalorder %s594_s13, 0  ;;  %p312_p2 = scmp.ge.s32.totalorder %s545_s12, 1 }
   0x7   : > { %p90_p3 = scmp.lt.s32.totalorder %s545_s12, 3  ;;  %p313_p4 = scmp.ne.s32.totalorder %s594_s13, 0 }
   0x8   : > { %p603_p5 = por %p38_p1, %p37_p0  ;;  %s101_s17 = sshll.u32 %s706_s1, 4  ;;  %s102_s17 = int_to_ptr.hbm [resolvable:$true] %s101_s17 }
   0x9   : > { %p610_p6 = pnand %p312_p2, %p90_p3  ;;  %s555_s19 = smov [#allocation5]  }
   0xa   : > { %s103_s20 = sshll.u32 %s555_s19, 4  ;;  %s619_s21 = sadd.s32 1, %s545_s12   ;;  %s104_s20 = int_to_ptr.vmem [resolvable:$true] %s103_s20 }
   0xb   : > { %p339_p7 = pneg %p610_p6  ;;  %s556_s22 = smov 128  }
   0xc   : > { %s557_s23 = smov 8   ;;  %s21_s24 = ssub.s32 %s545_s12, %s619_s21 }
   0xd   : > { %p340_p8 = pnand %p339_p7, %p38_p1  ;;  %s24_s25 = sadd.s32 1, %s541_s11 }
   0xe   : > { %p22_p9 = scmp.eq.s32.totalorder %s21_s24, 0  ;;  %p31_p10 = scmp.ne.s32.totalorder %s541_s11, %s537_s10 }
   0xf   : > { %342 = dma.hbm_to_vmem [thread:$0]  (!%p340_p8), %s102_s17, 2048, %s104_s20, [#allocation6], %s556_s22, %s556_s22, %s557_s23  }
  0x10   : > { %p32_p11 = scmp.eq.s32.totalorder %s545_s12, 0  ;;  %p348_p12 = scmp.lt.s32.totalorder %s545_s12, 2 }
  0x11   : > { %s632_s26 = scalar_select %p22_p9, %s541_s11, %s24_s25  }
  0x12   : > { %p33_p13 = por %p32_p11, %p31_p10  ;;  %s117_s27 = sand.u32 1, %s541_s11  }
  0x13   : > { %s315_s28 = sshll.u32 %s117_s27, 5  ;;  %s328_s29 = sshll.u32 %s545_s12, 5 }
  0x14   : > { %s126_s4 = scalar_lea.hbm %s705_s0, %s328_s29  ;;  %s121_s5 = scalar_lea.vmem [#allocation2], %s315_s28 }
  0x15   : > { %s129_s6 = sshll.u32 %s121_s5, 4  ;;  %s127_s7 = sshll.u32 %s126_s4, 4  ;;  %s130_s6 = int_to_ptr.vmem [resolvable:$true] %s129_s6  ;;  %s128_s7 = int_to_ptr.hbm [resolvable:$true] %s127_s7 }
  0x16   : > { %p639_p0 = pnand %p348_p12, %p33_p13  ;;  %s118_s9 = scalar_lea.sflag [#allocation3], %s117_s27 }
  0x17   : > { %s437_s15 = sshra.s32 %s128_s7, 4  ;;  %s444_s19 = scalar_lea.hbm %s705_s0, 64  ;;  %s438_s15 = int_to_ptr.hbm [resolvable:$true] %s437_s15 }
  0x18   : > { %s439_s16 = scalar_lea.hbm %s438_s15, 32  ;;  %p441_p3 = pneg %p639_p0 }
  0x19   : > { %p440_p2 = scmp.ne.s32.totalorder %s438_s15, %s439_s16  ;;  %p445_p9 = scmp.lt.s32.totalorder %s438_s15, %s705_s0 }
  0x1a   : > { %p446_p10 = scmp.lt.s32.totalorder %s444_s19, %s439_s16 }
  0x1b   : > { %p442_p7 = pnand %p441_p3, %p440_p2 }
  0x1c   : > { %p447_p11 = por %p446_p10, %p445_p9 }
  0x1d   : > { %p443_p8 = pneg %p442_p7 }
  0x1f   : > { %p448_p12 = pnand %p447_p11, %p443_p8 }
  0x21   : > { %451 = shalt.err (!%p448_p12)
}
  0x22   : > { %346 = dma.hbm_to_vmem [thread:$0]  (!%p639_p0), %s128_s7, 512, %s130_s6, %s118_s9, %s556_s22, %s556_s22, %s557_s23  }
  0x23   : > { %141 = sbr.rel (%p610_p6) target bundleno = 229 (0xe5), region = 28  ;;  %s143_s25 = sand.u32 (!%p610_p6), 1, %s537_s10  }
  0x24   : > { %s659_s27 = sshll.u32 (!%p610_p6), %s143_s25, 5  ;;  %s144_s28 = scalar_lea.sflag (!%p610_p6), [#allocation3], %s143_s25 }
  0x25   : > { %s147_s29 = scalar_lea.vmem (!%p610_p6), [#allocation2], %s659_s27 }
  0x28   : > { %520 = dma.done.wait (%p603_p5), %s144_s28, 512  }
  0x29   : > { %522 = vsyncadd (%p603_p5), %s144_s28, 4294966784 }
  0x2a   : > { %524 = dma.done.wait (%p38_p1), [#allocation6], 2048  }
  0x2b   : > { %526 = vsyncadd (%p38_p1), [#allocation6], 4294965248  ;;  %173 = sbr.rel (%p313_p4) target bundleno = 50 (0x32), region = 40 }
  0x30   : > { %v558_v0 = vmov 0.0  }
  0x31   : > { %174 = vst [vmem:[#allocation7] sm:$0xff] %v558_v0 }
  0x32 PF: > { %v175_v1 = vld [vmem:[#allocation5] sm:$0xff]  ;;  %v176_v2 = vld [vmem:[#allocation5 + $0x8] sm:$0xff]  ;;  %v177_v3 = vld [vmem:[#allocation5 + $0x10] sm:$0xff]  ;;  %s322_s18 = sshll.u32 %s594_s13, 2  ;;  %s675_s22 = smov 0  }
  0x33   : > { %v178_v4 = vld [vmem:[#allocation5 + $0x18] sm:$0xff]  ;;  %v179_v5 = vld [vmem:[#allocation5 + $0x20] sm:$0xff]  ;;  %v180_v6 = vld [vmem:[#allocation5 + $0x28] sm:$0xff]  ;;  %s673_s14 = ssub.s32 8, %s322_s18 }
  0x34   : > { %v181_v7 = vld [vmem:[#allocation5 + $0x30] sm:$0xff]  ;;  %v182_v8 = vld [vmem:[#allocation5 + $0x38] sm:$0xff]  ;;  %v183_v9 = vld [vmem:[#allocation5 + $0x40] sm:$0xff] }
  0x35   : > { %v184_v10 = vld [vmem:[#allocation5 + $0x48] sm:$0xff]  ;;  %v185_v11 = vld [vmem:[#allocation5 + $0x50] sm:$0xff]  ;;  %v186_v12 = vld [vmem:[#allocation5 + $0x58] sm:$0xff] }
  0x36   : > { %v187_v13 = vld [vmem:[#allocation5 + $0x60] sm:$0xff]  ;;  %v188_v14 = vld [vmem:[#allocation5 + $0x68] sm:$0xff]  ;;  %v189_v15 = vld [vmem:[#allocation5 + $0x70] sm:$0xff] }
  0x37   : > { %v190_v16 = vld [vmem:[#allocation5 + $0x78] sm:$0xff] }
  0x38   : > { %v193_v17 = vld [vmem:[#allocation7] sm:$0xff]  }
  0x39   : > { %v547_v18 = vmov %v193_v17  }
  0x3a LB: >> { %204 = vmatpush.msra.mxu0 %v190_v16  ;;  %s323_s23 = sshll.u32 %s553_s22, 3  ;;  %p226_p1 = scmp.lt.s32.totalorder %s553_s22, %s673_s14  ;;  %s553_s22 = sphi %s675_s22, %s199_s22   ;;  %v549_v18 = vphi %v547_v18, %v548_v18  }
  0x3b   : >> { %s202_s30 = scalar_lea.vmem %s147_s29, %s323_s23 [#allocation2]  ;;  %s199_s22 = sadd.s32 1, %s553_s22  }
  0x3c   : >> { %205 = vmatpush.msra.mxu0 %v189_v15  ;;  %v203_v19 = vld [vmem:[%s202_s30] sm:$0xff]  ;;  %s227_s3 = scalar_select %p226_p1, 1, 0 }
  0x3d   : >> { %p196_p4 = scmp.ge.s32.totalorder %s199_s22, 4  }
  0x3e   : >> { %206 = vmatpush.msra.mxu0 %v188_v14  ;;  %v228_v22 = vstv %s227_s3  ;;  %p350_p5 = scmp.eq.s32.totalorder (%p196_p4), %s594_s13, 1  ;;  %s240_s6 = sshll.u32 (%p196_p4), %s707_s2, 4  ;;  %s241_s6 = int_to_ptr.hbm [resolvable:$true] %s240_s6 }
  0x3f   : >> { %vm229_vm0 = vcmp.eq.s32.totalorder %v228_v22, 1  ;;  %s559_s7 = smov (%p196_p4), [#allocation7]  }
  0x40   : >> { %207 = vmatpush.msra.mxu0 %v187_v13  ;;  %s238_s8 = sshll.u32 (%p196_p4), %s559_s7, 4  ;;  %s239_s8 = int_to_ptr.vmem [resolvable:$true] %s238_s8 }
  0x42   : >> { %208 = vmatpush.msra.mxu0 %v186_v12 }
  0x44   : >> { %209 = vmatpush.msra.mxu0 %v185_v11 }
  0x46   : >> { %210 = vmatpush.msra.mxu0 %v184_v10 }
  0x48   : >> { %211 = vmatpush.msra.mxu0 %v183_v9 }
  0x4a   : >> { %212 = vmatpush.msra.mxu0 %v182_v8 }
  0x4c   : >> { %213 = vmatpush.msra.mxu0 %v181_v7 }
  0x4e   : >> { %214 = vmatpush.msra.mxu0 %v180_v6 }
  0x50   : >> { %215 = vmatpush.msra.mxu0 %v179_v5 }
  0x52   : >> { %216 = vmatpush.msra.mxu0 %v178_v4 }
  0x54   : >> { %217 = vmatpush.msra.mxu0 %v177_v3 }
  0x56   : >> { %218 = vmatpush.msra.mxu0 %v176_v2 }
  0x58   : >> { %219 = vmatpush.msra.mxu0 %v175_v1 }
  0x59   : >> { %220 = vmatmul.f32.vlgmr.msra.gmra.mxu0 %v549_v18 }
  0xd6   : >> { %v221_v20 = vpop.f32.mrf.mxu0 }
  0xd7   : >> { %v224_v21 = vadd.f32 %v221_v20, %v203_v19 }
  0xd9   : >> { %405 = vtanh.f32 %v224_v21 }
  0xdd   : > { %198 = sbr.rel (!%p196_p4) target bundleno = 58 (0x3a), region = 81 }
  0xdf   : >> { %v406_v23 = vpop.eup %405 }
  0xe0   : >> { %v230_v24 = vsel %vm229_vm0, %v406_v23, %v549_v18  }
  0xe1   : >> { %v548_v18 = vmov %v230_v24   ;;  %231 = vst [vmem:[#allocation7] sm:$0xff] (%p196_p4), %v230_v24 }
  0xe2   : > { %336 = dma.vmem_to_hbm [thread:$0]  (%p350_p5), %s239_s8, 128, %s241_s6, [#allocation4]  }
  0xe3   : > { %528 = dma.done.wait (%p350_p5), [#allocation4], 128  }
  0xe4   : > { %530 = vsyncadd (%p350_p5), [#allocation4], 4294967168 }
  0xe5 PF: > { %p14_p6 = scmp.ge.s32.totalorder %s619_s21, 4   ;;  %s711_s9 = smov %s537_s10 }
  0xe6   : > { %s712_s10 = smov %s541_s11  ;;  %s713_s11 = smov %s632_s26 }
  0xe7   : > { %s714_s12 = smov %s619_s21  ;;  %16 = sbr.rel (!%p14_p6) target bundleno = 5 (0x5), region = 92 }
  0xec   :  { %254 = vsyncpa [#allocation3], 1 }
  0xed   :  { %256 = vsyncpa [#allocation3 + $0x1], 1 }
  0xee   :  { %257 = vsyncpa [#allocation6], 1 }
  0xef   :  { %258 = vsyncpa [#allocation4], 1 }
  0xf0   :  { %260 = vsyncpa [#allocation4 + $0x1], 1 }

</bundles_post_ra>
